<compile_context>
chip_gen: v7x
topology: tpu7x:2x2x1
jax: 0.10.0
libtpu: 0.0.40
codegen_flags: <defaults>
</compile_context>

<pallas_src>
import math

import jax
import jax.numpy as jnp
from jax.experimental import pallas as pl
from jax.experimental.pallas import tpu as pltpu


def _attn_kernel(state_ref, patient_ref, wp_ref, ws_ref, bs_ref, wa_ref,
                 ba_ref, o_ref):
    RS, D = state_ref.shape                  # RS = tb * S (flat state rows)
    RP = patient_ref.shape[0]                # RP = tb * P (flat patient rows)
    TB = o_ref.shape[0]                      # batch rows this step
    S = RS // TB
    P = RP // TB                             # == 2 * S

    patient = patient_ref[...]               # (RP, D), possibly bf16
    state = state_ref[...]                   # (RS, D), possibly bf16

    # Two K=D projections on sublane-dense flat row blocks (MXU, f32 accum).
    hp = jnp.dot(patient, wp_ref[...],
                 preferred_element_type=jnp.float32)                 # (RP, D)
    hs = jnp.dot(state, ws_ref[...],
                 preferred_element_type=jnp.float32) + bs_ref[...]   # (RS, D)

    # torch: state.repeat(1, 2, 1), applied to the *projected* state.
    # Batches are grouped G at a time so every reshape keeps an 8-aligned
    # second-minor dim (S itself may be < 8); the only real data movement is
    # on the small (tb*S, D) projected-state tensor.
    G = 8 // math.gcd(S, 8)
    hs_g = hs.reshape(TB // G, G * S, D)
    pieces = []
    for g in range(G):
        blk = hs_g[:, g * S:(g + 1) * S, :]  # (TB//G, S, D)
        pieces += [blk, blk]
    hs_rep = jnp.concatenate(pieces, axis=1).reshape(TB, P, D)        # (TB,P,D)

    hp3 = hp.reshape(TB, P, D)               # regroups whole 8-row sublane tiles
    x = jnp.tanh(hp3 + hs_rep)               # f32 epilogue (no bf16 VPU on v5e)

    # agg (dim -> 1) as a lane reduction; scalar bias comes from SMEM.
    logits = (jnp.sum(x * wa_ref[...][None, :, :], axis=-1, keepdims=True)
              + ba_ref[0, 0])                                         # (TB,P,1)

    # softmax over the sequence axis (torch dim=1).
    m = jnp.max(logits, axis=1, keepdims=True)
    e = jnp.exp(logits - m)
    inv = pl.reciprocal(jnp.sum(e, axis=1, keepdims=True), approx=True)
    w = e * inv                                                       # (TB,P,1)

    # (patient * w).sum(dim=1)
    patient3 = patient.reshape(TB, P, D).astype(jnp.float32)
    o_ref[...] = jnp.sum(patient3 * w, axis=1).astype(o_ref.dtype)    # (TB, D)


def _pick_tb(B, S, P, D, itemsize):
    """Batch rows per grid step.

    (a) Fill the MXU M dim (tb*P >= ~512) and move >= ~1 MiB of input per
        step so the per-step pipeline overhead is amortized.
    (b) Cap by a ~40 MiB VMEM budget (double-buffered inputs + f32 temps +
        output) so the kernel fits v7x's 64 MiB VMEM with headroom.
    (c) Keep at least 2 grid steps when the batch allows, so both v7x
        TensorCores get work under dimension_semantics=("parallel",).
    """
    tb = max(8, (512 + P - 1) // P)
    tb = max(tb, (1 << 20) // max(1, itemsize * (S + P) * D))
    per_batch = (2 * itemsize + 3 * 4) * (S + P) * D + 2 * 4 * D
    tb = min(tb, max(8, (40 * 1024 * 1024) // per_batch))
    tb = max(8, (tb // 8) * 8)
    b8 = ((B + 7) // 8) * 8
    tb = min(tb, b8)
    while b8 // tb < 2 and tb > 8:
        tb -= 8
    return tb


def state_patient_attention_forward(state, patient, params, *, tb=None,
                                    matmul_dtype=None):
    """state: (B, S, D), patient: (B, 2S, D) -> (B, D).

    params = (wp, ws, bs, wa, ba) with
      wp: (D, D)  == patient_linear.weight.T
      ws: (D, D)  == state_linear.weight.T
      bs: (1, D)  == state_linear.bias
      wa: (1, D)  == agg.weight
      ba: (1, 1)  == agg.bias

    matmul_dtype: optional (e.g. jnp.bfloat16) cast of the matmul operands
    only; accumulation and the tanh/softmax epilogue stay f32.
    """
    wp, ws, bs, wa, ba = params
    B, S, D = state.shape
    P = patient.shape[1]
    assert P == 2 * S, "patient seq-len must be 2x state seq-len"

    if matmul_dtype is not None:
        state = state.astype(matmul_dtype)
        patient = patient.astype(matmul_dtype)
        wp = wp.astype(matmul_dtype)
        ws = ws.astype(matmul_dtype)

    itemsize = jnp.dtype(state.dtype).itemsize
    if tb is None:
        tb = _pick_tb(B, S, P, D, itemsize)

    # Pad batch to a multiple of tb (padded rows are all-zero -> uniform
    # softmax -> zero output rows, sliced off below).
    Bp = ((B + tb - 1) // tb) * tb
    if Bp != B:
        pad = Bp - B
        state = jnp.pad(state, ((0, pad), (0, 0), (0, 0)))
        patient = jnp.pad(patient, ((0, pad), (0, 0), (0, 0)))

    # Free HBM-side flatten: sublane-dense 2D row blocks feed the MXU directly.
    state_flat = state.reshape(Bp * S, D)
    patient_flat = patient.reshape(Bp * P, D)

    bs2 = jnp.asarray(bs, jnp.float32).reshape(1, D)
    wa2 = jnp.asarray(wa, jnp.float32).reshape(1, D)
    ba2 = jnp.asarray(ba, jnp.float32).reshape(1, 1)

    grid = (Bp // tb,)

    flops = (2 * Bp * P * D * D            # patient projection
             + 2 * Bp * S * D * D          # state projection (un-repeated)
             + 8 * Bp * P * D)             # elementwise epilogue
    transcendentals = Bp * P * D + Bp * P + Bp
    bytes_accessed = (itemsize * (Bp * S * D + Bp * P * D + 2 * D * D)
                      + 4 * (2 * D + 1 + Bp * D))

    cp_kwargs = dict(dimension_semantics=("parallel",))
    est_vmem = (2 * itemsize * tb * (S + P) * D    # double-buffered inputs
                + 4 * itemsize * D * D             # resident Wp/Ws
                + 4 * 4 * tb * P * D               # f32 activation temps
                + 2 * 4 * tb * D + 4 * 4 * D)      # output + bias/agg rows
    if est_vmem > 30 * 1024 * 1024:
        # Raise the scoped VMEM limit only when needed; cap well under v7x's
        # 64 MiB physical VMEM.
        cp_kwargs["vmem_limit_bytes"] = min(int(est_vmem * 1.4),
                                            48 * 1024 * 1024)

    out = pl.pallas_call(
        _attn_kernel,
        out_shape=jax.ShapeDtypeStruct((Bp, D), jnp.float32),
        grid=grid,
        in_specs=[
            pl.BlockSpec((tb * S, D), lambda b: (b, 0)),   # state rows
            pl.BlockSpec((tb * P, D), lambda b: (b, 0)),   # patient rows
            pl.BlockSpec((D, D), lambda b: (0, 0)),        # Wp (resident)
            pl.BlockSpec((D, D), lambda b: (0, 0)),        # Ws (resident)
            pl.BlockSpec((1, D), lambda b: (0, 0)),        # bs
            pl.BlockSpec((1, D), lambda b: (0, 0)),        # wa
            pl.BlockSpec(memory_space=pltpu.MemorySpace.SMEM),  # ba scalar
        ],
        out_specs=pl.BlockSpec((tb, D), lambda b: (b, 0)),
        compiler_params=pltpu.CompilerParams(**cp_kwargs),
        cost_estimate=pl.CostEstimate(
            flops=flops, transcendentals=transcendentals,
            bytes_accessed=bytes_accessed),
    )(state_flat, patient_flat, wp, ws, bs2, wa2, ba2)
    return out[:B]


def _ref_forward(state, patient, params):
    """Pure-JAX reference mirroring the PyTorch module."""
    wp, ws, bs, wa, ba = params
    p = patient @ wp                                       # patient_linear (no bias)
    s = state @ ws + bs                                    # state_linear
    x = jnp.tanh(p + jnp.tile(s, (1, 2, 1)))               # state.repeat(1, 2, 1)
    logits = x @ wa.T + ba                                 # agg -> (B, P, 1)
    w = jax.nn.softmax(logits, axis=1)
    return jnp.sum(patient * w, axis=1)                    # (B, D)


if __name__ == "__main__":
    dim = 32
    batch = 16
    s_len = 4                      # state: (B, 4, 32), patient: (B, 8, 32)

    key = jax.random.PRNGKey(0)
    ks = jax.random.split(key, 7)
    state = jax.random.normal(ks[0], (batch, s_len, dim), jnp.float32)
    patient = jax.random.normal(ks[1], (batch, 2 * s_len, dim), jnp.float32)

    scale = 1.0 / (dim ** 0.5)
    wp = scale * jax.random.normal(ks[2], (dim, dim), jnp.float32)   # patient_linear.weight.T
    ws = scale * jax.random.normal(ks[3], (dim, dim), jnp.float32)   # state_linear.weight.T
    bs = scale * jax.random.normal(ks[4], (1, dim), jnp.float32)     # state_linear.bias
    wa = scale * jax.random.normal(ks[5], (1, dim), jnp.float32)     # agg.weight
    ba = scale * jax.random.normal(ks[6], (1, 1), jnp.float32)       # agg.bias
    params = (wp, ws, bs, wa, ba)

    ref = _ref_forward(state, patient, params)

    # f32 operands; relative tolerance covers the EUP approximate reciprocal
    # used for the softmax normalization (purely multiplicative error).
    out = state_patient_attention_forward(state, patient, params)
    jax.block_until_ready(out)
    assert out.shape == (batch, dim)
    assert jnp.allclose(out, ref, atol=1e-5, rtol=2e-2), "f32 mismatch vs reference"

    # bf16 matmul operands (native MXU dtype on v5e/v6e/v7x), f32 epilogue.
    out_bf16 = state_patient_attention_forward(state, patient, params,
                                               matmul_dtype=jnp.bfloat16)
    jax.block_until_ready(out_bf16)
    assert jnp.allclose(out_bf16, ref, atol=5e-2, rtol=5e-2), "bf16 mismatch vs reference"

    print("KERNEL_OK")
</pallas_src>

<mosaic_0001>
module attributes {stable_mosaic.version = 11 : i64} {
  func.func @_attn_kernel(%arg0: i32, %arg1: memref<32x32xf32, #tpu.memory_space<vmem>>, %arg2: memref<64x32xf32, #tpu.memory_space<vmem>>, %arg3: memref<32x32xf32, #tpu.memory_space<vmem>>, %arg4: memref<32x32xf32, #tpu.memory_space<vmem>>, %arg5: memref<1x32xf32, #tpu.memory_space<vmem>>, %arg6: memref<1x32xf32, #tpu.memory_space<vmem>>, %arg7: memref<1x1xf32, #tpu.memory_space<smem>>, %arg8: memref<8x32xf32, #tpu.memory_space<vmem>>) attributes {dimension_semantics = [#tpu.dimension_semantics<parallel>], iteration_bounds = array<i64: 2>, scalar_prefetch = 0 : i64, scratch_operands = 0 : i64, tpu.core_type = #tpu.core_type<tc>, window_params = [{transform_indices = @transform_0, window_bounds = array<i64: 32, 32>}, {transform_indices = @transform_1, window_bounds = array<i64: 64, 32>}, {pipeline_mode = #tpu.pipeline_mode<synchronous>, transform_indices = @transform_2, window_bounds = array<i64: 32, 32>}, {pipeline_mode = #tpu.pipeline_mode<synchronous>, transform_indices = @transform_3, window_bounds = array<i64: 32, 32>}, {pipeline_mode = #tpu.pipeline_mode<synchronous>, transform_indices = @transform_4, window_bounds = array<i64: 1, 32>}, {pipeline_mode = #tpu.pipeline_mode<synchronous>, transform_indices = @transform_5, window_bounds = array<i64: 1, 32>}, {transform_indices = @transform_6, window_bounds = array<i64: 1, 1>}, {transform_indices = @transform_7, window_bounds = array<i64: 8, 32>}]} {
    %c0 = arith.constant 0 : index
    %c0_0 = arith.constant 0 : index
    %0 = vector.load %arg2[%c0, %c0_0] : memref<64x32xf32, #tpu.memory_space<vmem>>, vector<64x32xf32>
    %c0_1 = arith.constant 0 : index
    %c0_2 = arith.constant 0 : index
    %1 = vector.load %arg1[%c0_1, %c0_2] : memref<32x32xf32, #tpu.memory_space<vmem>>, vector<32x32xf32>
    %c0_3 = arith.constant 0 : index
    %c0_4 = arith.constant 0 : index
    %2 = vector.load %arg3[%c0_3, %c0_4] : memref<32x32xf32, #tpu.memory_space<vmem>>, vector<32x32xf32>
    %cst = arith.constant dense<0.000000e+00> : vector<64x32xf32>
    %3 = tpu.matmul %0, %2, %cst {dimension_numbers = #tpu.dot_dimension_numbers<[1], [0], [0], [1], [0, 0, 1, 1], [], []>} : vector<64x32xf32>, vector<32x32xf32>, vector<64x32xf32> -> vector<64x32xf32>
    %c0_5 = arith.constant 0 : index
    %c0_6 = arith.constant 0 : index
    %4 = vector.load %arg4[%c0_5, %c0_6] : memref<32x32xf32, #tpu.memory_space<vmem>>, vector<32x32xf32>
    %cst_7 = arith.constant dense<0.000000e+00> : vector<32x32xf32>
    %5 = tpu.matmul %1, %4, %cst_7 {dimension_numbers = #tpu.dot_dimension_numbers<[1], [0], [0], [1], [0, 0, 1, 1], [], []>} : vector<32x32xf32>, vector<32x32xf32>, vector<32x32xf32> -> vector<32x32xf32>
    %c0_8 = arith.constant 0 : index
    %c0_9 = arith.constant 0 : index
    %6 = vector.load %arg5[%c0_8, %c0_9] : memref<1x32xf32, #tpu.memory_space<vmem>>, vector<1x32xf32>
    %7 = vector.broadcast %6 : vector<1x32xf32> to vector<32x32xf32>
    %8 = arith.addf %5, %7 : vector<32x32xf32>
    %9 = vector.shape_cast %8 : vector<32x32xf32> to vector<4x8x32xf32>
    %10 = vector.extract_strided_slice %9 {offsets = [0, 0, 0], sizes = [4, 4, 32], strides = [1, 1, 1]} : vector<4x8x32xf32> to vector<4x4x32xf32>
    %11 = vector.extract_strided_slice %9 {offsets = [0, 4, 0], sizes = [4, 4, 32], strides = [1, 1, 1]} : vector<4x8x32xf32> to vector<4x4x32xf32>
    %12 = tpu.concatenate %10, %10, %11, %11 in 1 : vector<4x4x32xf32>, vector<4x4x32xf32>, vector<4x4x32xf32>, vector<4x4x32xf32> -> vector<4x16x32xf32>
    %13 = vector.shape_cast %12 : vector<4x16x32xf32> to vector<8x8x32xf32>
    %14 = vector.shape_cast %3 : vector<64x32xf32> to vector<8x8x32xf32>
    %15 = arith.addf %14, %13 : vector<8x8x32xf32>
    %16 = math.tanh %15 : vector<8x8x32xf32>
    %c0_10 = arith.constant 0 : index
    %c0_11 = arith.constant 0 : index
    %17 = vector.load %arg6[%c0_10, %c0_11] : memref<1x32xf32, #tpu.memory_space<vmem>>, vector<1x32xf32>
    %18 = vector.shape_cast %17 : vector<1x32xf32> to vector<1x1x32xf32>
    %19 = vector.broadcast %18 : vector<1x1x32xf32> to vector<8x8x32xf32>
    %20 = arith.mulf %16, %19 : vector<8x8x32xf32>
    %cst_12 = arith.constant dense<0.000000e+00> : vector<8x8xf32>
    %21 = vector.multi_reduction <add>, %20, %cst_12 [2] : vector<8x8x32xf32> to vector<8x8xf32>
    %22 = vector.shape_cast %21 : vector<8x8xf32> to vector<8x8x1xf32>
    %c0_13 = arith.constant 0 : index
    %c0_14 = arith.constant 0 : index
    %23 = memref.load %arg7[%c0_13, %c0_14] : memref<1x1xf32, #tpu.memory_space<smem>>
    %24 = vector.broadcast %23 : f32 to vector<8x8x1xf32>
    %25 = arith.addf %22, %24 : vector<8x8x1xf32>
    %cst_15 = arith.constant dense<0xFF800000> : vector<8x1xf32>
    %26 = vector.multi_reduction <maximumf>, %25, %cst_15 [1] : vector<8x8x1xf32> to vector<8x1xf32>
    %27 = vector.shape_cast %26 : vector<8x1xf32> to vector<8x1x1xf32>
    %28 = vector.broadcast %27 : vector<8x1x1xf32> to vector<8x8x1xf32>
    %29 = arith.subf %25, %28 : vector<8x8x1xf32>
    %30 = math.exp %29 : vector<8x8x1xf32>
    %cst_16 = arith.constant dense<0.000000e+00> : vector<8x1xf32>
    %31 = vector.multi_reduction <add>, %30, %cst_16 [1] : vector<8x8x1xf32> to vector<8x1xf32>
    %32 = vector.shape_cast %31 : vector<8x1xf32> to vector<8x1x1xf32>
    %33 = tpu.reciprocal %32 {approx = true} : vector<8x1x1xf32> -> vector<8x1x1xf32>
    %34 = vector.broadcast %33 : vector<8x1x1xf32> to vector<8x8x1xf32>
    %35 = arith.mulf %30, %34 : vector<8x8x1xf32>
    %36 = vector.shape_cast %0 : vector<64x32xf32> to vector<8x8x32xf32>
    %37 = vector.broadcast %35 : vector<8x8x1xf32> to vector<8x8x32xf32>
    %38 = arith.mulf %36, %37 : vector<8x8x32xf32>
    %cst_17 = arith.constant dense<0.000000e+00> : vector<8x32xf32>
    %39 = vector.multi_reduction <add>, %38, %cst_17 [1] : vector<8x8x32xf32> to vector<8x32xf32>
    %c0_18 = arith.constant 0 : index
    %c0_19 = arith.constant 0 : index
    %40 = vector.load %arg8[%c0_18, %c0_19] : memref<8x32xf32, #tpu.memory_space<vmem>>, vector<8x32xf32>
    tpu.vector_store %arg8[%c0_18, %c0_19], %39 {strides = array<i32>} : memref<8x32xf32, #tpu.memory_space<vmem>>, vector<8x32xf32>,
    return
  }
  func.func @transform_0(%arg0: i32) -> (i32, i32) {
    %c0_i32 = arith.constant 0 : i32
    %c0_i32_0 = arith.constant 0 : i32
    return %arg0, %c0_i32 : i32, i32
  }
  func.func @transform_1(%arg0: i32) -> (i32, i32) {
    %c0_i32 = arith.constant 0 : i32
    %c0_i32_0 = arith.constant 0 : i32
    return %arg0, %c0_i32 : i32, i32
  }
  func.func @transform_2(%arg0: i32) -> (i32, i32) {
    %c0_i32 = arith.constant 0 : i32
    %c0_i32_0 = arith.constant 0 : i32
    %c0_i32_1 = arith.constant 0 : i32
    return %c0_i32, %c0_i32_0 : i32, i32
  }
  func.func @transform_3(%arg0: i32) -> (i32, i32) {
    %c0_i32 = arith.constant 0 : i32
    %c0_i32_0 = arith.constant 0 : i32
    %c0_i32_1 = arith.constant 0 : i32
    return %c0_i32, %c0_i32_0 : i32, i32
  }
  func.func @transform_4(%arg0: i32) -> (i32, i32) {
    %c0_i32 = arith.constant 0 : i32
    %c0_i32_0 = arith.constant 0 : i32
    %c0_i32_1 = arith.constant 0 : i32
    return %c0_i32, %c0_i32_0 : i32, i32
  }
  func.func @transform_5(%arg0: i32) -> (i32, i32) {
    %c0_i32 = arith.constant 0 : i32
    %c0_i32_0 = arith.constant 0 : i32
    %c0_i32_1 = arith.constant 0 : i32
    return %c0_i32, %c0_i32_0 : i32, i32
  }
  func.func @transform_6(%arg0: i32) -> (i32, i32) {
    %c0_i32 = arith.constant 0 : i32
    %c0_i32_0 = arith.constant 0 : i32
    %c0_i32_1 = arith.constant 0 : i32
    return %c0_i32, %c0_i32_0 : i32, i32
  }
  func.func @transform_7(%arg0: i32) -> (i32, i32) {
    %c0_i32 = arith.constant 0 : i32
    %c0_i32_0 = arith.constant 0 : i32
    return %arg0, %c0_i32 : i32, i32
  }
}

</mosaic_0001>

<bundles_post_ra>
// kernel: tpu_custom_call.1
= control target key start
LH: loop header
LB: loop body
LE: loop exit
PB: predicated region body
PF: predicated region fallthrough
CT: control target
= control target key end

     0   :  { %s1494_s0 = inlined_call_operand.vmem [shape: f32[64,32], index: 0, kind: input, shape index: {}]   ;;  %s1495_s1 = inlined_call_operand.vmem [shape: f32[128,32], index: 1, kind: input, shape index: {}]   ;;  %s1496_s2 = inlined_call_operand.vmem [shape: f32[32,32], index: 2, kind: input, shape index: {}]   ;;  %s1497_s3 = inlined_call_operand.vmem [shape: f32[32,32], index: 3, kind: input, shape index: {}]   ;;  %s1498_s4 = inlined_call_operand.vmem [shape: f32[1,32], index: 4, kind: input, shape index: {}]   ;;  %s1499_s5 = inlined_call_operand.vmem [shape: f32[1,32], index: 5, kind: input, shape index: {}]   ;;  %s1500_s6 = inlined_call_operand.<no memory space> [shape: f32[1,1], index: 6, kind: input, shape index: {}]   ;;  %s1501_s7 = inlined_call_operand.hbm [shape: f32[16,32], index: 7, kind: output, shape index: {}]  }
   0x1   :  { %12 = sst [smem:[#allocation2]] %s1500_s6 }
   0x2   :  { %13 = vsyncpa [#allocation4], 0 }
   0x3   :  { %15 = vsyncpa [#allocation4 + $0x1], 0  ;;  %s1243_s26 = smov 0   ;;  %s1245_s27 = smov 0  }
   0x4   :  { %s1247_s28 = smov 0   ;;  %s1249_s29 = smov 0  }
   0x5 LB: > { %s1264_s6 = sadd.s32 4294967295, %s1197_s29   ;;  %s951_s30 = sadd.s32 4294967294, %s1197_s29   ;;  %s1197_s29 = sphi %s1249_s29, %s1507_s29   ;;  %s1193_s28 = sphi %s1247_s28, %s1506_s28   ;;  %s1189_s27 = sphi %s1245_s27, %s1505_s27   ;;  %s1185_s26 = sphi %s1243_s26, %s1504_s26  }
   0x6   : > { %s1268_s8 = sadd.s32 1, %s1197_s29   ;;  %s185_s9 = sadd.s32 1, %s1193_s28 }
   0x7   : > { %s182_s10 = ssub.s32 %s1197_s29, %s1268_s8  ;;  %p195_p0 = scmp.ne.s32.totalorder %s1193_s28, %s1189_s27 }
   0x8   : > { %p183_p1 = scmp.eq.s32.totalorder %s182_s10, 0  ;;  %p196_p2 = scmp.eq.s32.totalorder %s1264_s6, 1 }
   0x9   : > { %p201_p3 = scmp.ne.s32.totalorder %s1189_s27, %s1185_s26  ;;  %p202_p4 = scmp.eq.s32.totalorder %s951_s30, 1 }
   0xa   : > { %s1279_s11 = scalar_select %p183_p1, %s1193_s28, %s185_s9  }
   0xb   : > { %p1281_p5 = por %p196_p2, %p195_p0  ;;  %p1285_p6 = por %p202_p4, %p201_p3 }
   0xc   : > { %p954_p7 = scmp.ge.s32.totalorder %s1197_s29, 1  ;;  %p253_p8 = scmp.lt.s32.totalorder %s1197_s29, 3 }
   0xe   : > { %p254_p9 = pnand %p954_p7, %p253_p8 }
   0xf   : > { %v314_v0 = vld [vmem:[%s1496_s2] sm:$0xff] (!%p254_p9)  ;;  %v315_v1 = vld [vmem:[%s1496_s2 + $0x8] sm:$0xff] (!%p254_p9)  ;;  %s958_s20 = sshll.u32 (!%p254_p9), %s1264_s6, 3  ;;  %s956_s21 = sshll.u32 (!%p254_p9), %s1264_s6, 2  ;;  %v316_v5 = vld [vmem:[%s1496_s2 + $0x10] sm:$0xff] (!%p254_p9)  ;;  %vm318_vm0 = vcmask (!%p254_p9), 261120  }
  0x10   : > { %257 = sbr.rel (%p254_p9) target bundleno = 503 (0x1f7), region = 48  ;;  %v448_v2 = vld [vmem:[%s1497_s3] sm:$0xff] (!%p254_p9)  ;;  %v1032_v3 = vpack.c.bf16 (!%p254_p9), %v315_v1, %v314_v0  ;;  %v449_v4 = vld [vmem:[%s1497_s3 + $0x8] sm:$0xff] (!%p254_p9)  ;;  %v317_v6 = vld [vmem:[%s1496_s2 + $0x18] sm:$0xff] (!%p254_p9)  ;;  %p297_p10 = scmp.lt.s32.totalorder (!%p254_p9), %s958_s20, 15  ;;  %vm568_vm1 = vcmask (!%p254_p9), 1043456  }
  0x11   : > { %p291_p11 = scmp.lt.s32.totalorder (!%p254_p9), %s956_s21, 7  ;;  %v1040_v7 = vpack.c.bf16 (!%p254_p9), %v449_v4, %v448_v2  ;;  %v1036_v8 = vpack.c.bf16 (!%p254_p9), %v317_v6, %v316_v5  ;;  %v450_v9 = vld [vmem:[%s1497_s3 + $0x10] sm:$0xff] (!%p254_p9)  ;;  %v451_v10 = vld [vmem:[%s1497_s3 + $0x18] sm:$0xff] (!%p254_p9)  ;;  %v968_v24 = vld [vmem:[%s1498_s4] ss:$0 sm:$0xff] (!%p254_p9)  ;;  %s632_s14 = sld [smem:[#allocation2]] (!%p254_p9) }
  0x12   : > { %1033 = vmatprep.subr.bf16.mxu0 (!%p254_p9), %v1032_v3  ;;  %v1044_v11 = vpack.c.bf16 (!%p254_p9), %v451_v10, %v450_v9  ;;  %v973_v62 = vld [vmem:[%s1499_s5] ss:$0 sm:$0xff] (!%p254_p9)  ;;  %vm850_vm2 = vcmask (!%p254_p9), 1041409   ;;  %s287_s15 = sand.u32 (!%p254_p9), 1, %s1189_s27   ;;  %vm852_vm3 = vcmask (!%p254_p9), 1042434   ;;  %vm854_vm4 = vcmask (!%p254_p9), 1043459  }
  0x13   : > { %1041 = vmatprep.subr.bf16.mxu1 (!%p254_p9), %v1040_v7  ;;  %1035 = vmatpush3.bf16.msra.mxu0 (!%p254_p9), %v1032_v3  ;;  %s1440_s16 = sshll.u32 (!%p254_p9), %s287_s15, 3  ;;  %vm856_vm5 = vcmask (!%p254_p9), 1044484   ;;  %vm858_vm6 = vcmask (!%p254_p9), 1045509   ;;  %vm860_vm7 = vcmask (!%p254_p9), 1046534   ;;  %vm862_vm8 = vcmask (!%p254_p9), 1047559  }
  0x14   : > { %1043 = vmatpush3.bf16.msra.mxu1 (!%p254_p9), %v1040_v7  ;;  %1037 = vmatprep.subr.bf16.mxu0 (!%p254_p9), %v1036_v8  ;;  %s289_s18 = scalar_lea.vmem (!%p254_p9), [#allocation3], %s1440_s16 }
  0x15   : > { %1045 = vmatprep.subr.bf16.mxu1 (!%p254_p9), %v1044_v11  ;;  %s880_s19 = sshll.u32 (!%p254_p9), %s289_s18, 4  ;;  %s1451_s19 = int_to_ptr.vmem [resolvable:$true] %s880_s19 }
  0x16   : > { %s1135_s25 = scalar_lea.vmem (!%p254_p9), %s1451_s19, 128 }
  0x17   : > { %s1509_s20 = smov (!%p297_p10, %s958_s20), 15  ;;  %s1511_s21 = smov (!%p291_p11, %s956_s21), 7  ;;  %1039 = vmatpush3.bf16.msra.mxu0 %v1036_v8 }
  0x18   : > { %s959_s17 = sshll.u32 %s1509_s20, 3  ;;  %s957_s23 = sshll.u32 %s1511_s21, 3  ;;  %1047 = vmatpush3.bf16.msra.mxu1 %v1044_v11 }
  0x19   : > { %s300_s22 = scalar_lea.vmem %s1495_s1, %s959_s17  ;;  %s294_s30 = scalar_lea.vmem %s1494_s0, %s957_s23 }
  0x1a   : > { %v1320_v12 = vld [vmem:[%s300_s22] sm:$0xff]  ;;  %v1327_v14 = vld [vmem:[%s300_s22 + $0x8] sm:$0xff]  ;;  %v1330_v16 = vld [vmem:[%s300_s22 + $0x10] sm:$0xff]  ;;  %s975_s17 = sshll.u32 %s1264_s6, 7  ;;  %s867_s6 = scalar_lea.sflag [#allocation4], %s287_s15 }
  0x1b   : > { %1006 = vmatprep.mubr.msk.f32.mxu0 %vm318_vm0, %v1320_v12  ;;  %v310_v13 = vld [vmem:[%s294_s30] sm:$0xff]  ;;  %v311_v15 = vld [vmem:[%s294_s30 + $0x8] sm:$0xff]  ;;  %v312_v17 = vld [vmem:[%s294_s30 + $0x10] sm:$0xff]  ;;  %s1449_s24 = scalar_lea.hbm %s1501_s7, %s975_s17  ;;  %p1136_p12 = scmp.ne.s32.totalorder %s1451_s19, %s1135_s25 }
  0x1c   : > { %1026 = vmatprep.mubr.msk.f32.mxu1 %vm318_vm0, %v310_v13  ;;  %1007 = vmatmul.mubr.msk.f32.vlgmr.msra.gmra.mrb[0].mxu0 %vm318_vm0, %v1327_v14  ;;  %v1337_v18 = vld [vmem:[%s300_s22 + $0x18] sm:$0xff]  ;;  %v1340_v20 = vld [vmem:[%s300_s22 + $0x20] sm:$0xff]  ;;  %v1347_v21 = vld [vmem:[%s300_s22 + $0x28] sm:$0xff] }
  0x1d   : > { %1027 = vmatmul.mubr.msk.f32.vlgmr.msra.gmra.mrb[0].mxu1 %vm318_vm0, %v311_v15  ;;  %1009 = vmatprep.mubr.msk.f32.mxu0 %vm318_vm0, %v1330_v16  ;;  %v313_v19 = vld [vmem:[%s294_s30 + $0x18] sm:$0xff]  ;;  %v1349_v22 = vld [vmem:[%s300_s22 + $0x30] sm:$0xff]  ;;  %p1137_p13 = pnand %p1136_p12, %p1281_p5  ;;  %s1199_s30 = smov [#allocation3]  }
  0x1e   : > { %1029 = vmatprep.mubr.msk.f32.mxu1 %vm318_vm0, %v312_v17  ;;  %v1355_v23 = vld [vmem:[%s300_s22 + $0x38] sm:$0xff]  ;;  %s1139_s20 = sshll.u32 %s1199_s30, 4  ;;  %s1140_s20 = int_to_ptr.vmem [resolvable:$false] %s1139_s20 }
  0x1f   : > { %p1138_p0 = pneg %p1137_p13  ;;  %s1141_s21 = scalar_lea.vmem %s1140_s20, 256 }
  0x20   : > { %1010 = vmatmul.mubr.msk.f32.gmra.mrb[2].mxu0 %vm318_vm0, %v1337_v18  ;;  %p1142_p1 = scmp.lt.s32.totalorder %s1451_s19, %s1140_s20  ;;  %p1143_p2 = scmp.lt.s32.totalorder %s1141_s21, %s1135_s25 }
  0x21   : > { %1030 = vmatmul.mubr.msk.f32.gmra.mrb[2].mxu1 %vm318_vm0, %v313_v19  ;;  %1012 = vmatprep.mubr.msk.f32.mxu0 %vm318_vm0, %v1340_v20 }
  0x22   : > { %p1144_p3 = por %p1143_p2, %p1142_p1 }
  0x24   : > { %1013 = vmatmul.mubr.msk.f32.gmra.mrb[4].mxu0 %vm318_vm0, %v1347_v21  ;;  %p1145_p4 = pnand %p1144_p3, %p1138_p0 }
  0x25   : > { %1015 = vmatprep.mubr.msk.f32.mxu0 %vm318_vm0, %v1349_v22 }
  0x28   : > { %1016 = vmatmul.mubr.msk.f32.gmra.mrb[6].mxu0 %vm318_vm0, %v1355_v23 }
  0xef   : > { %v1008_v25 = vpop.f32.mrb[0].mxu0 }
  0xf0   : > { %v1028_v26 = vpop.f32.mrb[0].mxu1  ;;  %v409_v27 = vpop.f32.mrb[1].mxu0 }
  0xf1   : > { %v543_v28 = vadd.f32 %v1028_v26, %v968_v24  ;;  %v537_v29 = vpop.f32.mrb[1].mxu1 }
  0xf2   : > { %v538_v30 = vadd.f32 %v968_v24, %v537_v29 }
  0xf3   : > { %v561_v31 = vrot.slane %v543_v28, 4  ;;  %v1011_v32 = vpop.f32.mrb[2].mxu0 }
  0xf4   : > { %v560_v33 = vrot.slane %v538_v30, 4  ;;  %v419_v34 = vpop.f32.mrb[3].mxu0  ;;  %v1031_v35 = vpop.f32.mrb[2].mxu1 }
  0xf5   : > { %v574_v36 = vsel %vm568_vm1, %v561_v31, %v543_v28  ;;  %v570_v37 = vsel %vm568_vm1, %v543_v28, %v561_v31  ;;  %v553_v38 = vadd.f32 %v1031_v35, %v968_v24  ;;  %v547_v39 = vpop.f32.mrb[3].mxu1 }
  0xf6   : > { %v573_v40 = vsel %vm568_vm1, %v560_v33, %v538_v30  ;;  %v569_v41 = vsel %vm568_vm1, %v538_v30, %v560_v33  ;;  %v580_v42 = vadd.f32 %v1011_v32, %v574_v36  ;;  %v579_v43 = vadd.f32 %v570_v37, %v419_v34 }
  0xf7   : > { %v578_v44 = vadd.f32 %v1008_v25, %v573_v40  ;;  %v577_v45 = vadd.f32 %v569_v41, %v409_v27  ;;  %v563_v46 = vrot.slane %v553_v38, 4  ;;  %v548_v47 = vadd.f32 %v968_v24, %v547_v39  ;;  %v1014_v48 = vpop.f32.mrb[4].mxu0 }
  0xf8   : > { %1087 = vtanh.f32 %v580_v42  ;;  %v429_v49 = vpop.f32.mrb[5].mxu0  ;;  %v633_v30 = vstv %s632_s14 }
  0xf9   : > { %1089 = vtanh.f32 %v578_v44  ;;  %v562_v50 = vrot.slane %v548_v47, 4  ;;  %v576_v51 = vsel %vm568_vm1, %v563_v46, %v553_v38  ;;  %v572_v59 = vsel %vm568_vm1, %v553_v38, %v563_v46 }
  0xfa   : > { %1091 = vtanh.f32 %v577_v45 }
  0xfb   : > { %1093 = vtanh.f32 %v579_v43  ;;  %v575_v52 = vsel %vm568_vm1, %v562_v50, %v548_v47  ;;  %v571_v53 = vsel %vm568_vm1, %v548_v47, %v562_v50  ;;  %v1017_v54 = vpop.f32.mrb[6].mxu0 }
  0xfc   : > { %v582_v55 = vadd.f32 %v1014_v48, %v575_v52  ;;  %v581_v56 = vadd.f32 %v571_v53, %v429_v49  ;;  %v584_v57 = vadd.f32 %v1017_v54, %v576_v51  ;;  %v439_v58 = vpop.f32.mrb[7].mxu0 }
  0xfd   : > { %v583_v60 = vadd.f32 %v572_v59, %v439_v58 }
  0xfe   : > { %1095 = vtanh.f32 %v582_v55 }
  0xff   : > { %1097 = vtanh.f32 %v581_v56 }
 0x100   : > { %1099 = vtanh.f32 %v583_v60 }
 0x101   : > { %1101 = vtanh.f32 %v584_v57 }
 0x102   : > { %v1088_v61 = vpop.eup %1087 }
 0x103   : > { %v1090_v63 = vpop.eup %1089  ;;  %v603_v8 = vmul.f32 %v1088_v61, %v973_v62 }
 0x104   : > { %v1092_v0 = vpop.eup %1091  ;;  %v601_v5 = vmul.f32 %v1090_v63, %v973_v62 }
 0x105   : > { %v1094_v1 = vpop.eup %1093  ;;  %v600_v2 = vmul.f32 %v1092_v0, %v973_v62  ;;  %v617_v15 = vsel %vm318_vm0, %v603_v8, 0.0 }
 0x106   : > { %v602_v3 = vmul.f32 %v1094_v1, %v973_v62  ;;  %v611_v10 = vsel %vm318_vm0, %v601_v5, 0.0 }
 0x107   : > { %v608_v4 = vsel %vm318_vm0, %v600_v2, 0.0 }
 0x108   : > { %v1096_v6 = vpop.eup %1095  ;;  %v614_v7 = vsel %vm318_vm0, %v602_v3, 0.0  ;;  %609 = vadd.xlane.f32.xlu0 %v608_v4 }
 0x109   : > { %v1098_v9 = vpop.eup %1097  ;;  %615 = vadd.xlane.f32.xlu1 %v614_v7  ;;  %v605_v17 = vmul.f32 %v1096_v6, %v973_v62 }
 0x10a   : > { %v604_v11 = vmul.f32 %v1098_v9, %v973_v62  ;;  %v1100_v13 = vpop.eup %1099 }
 0x10b   : > { %v1102_v19 = vpop.eup %1101  ;;  %v606_v25 = vmul.f32 %v1100_v13, %v973_v62  ;;  %v623_v26 = vsel %vm318_vm0, %v605_v17, 0.0 }
 0x10c   : > { %612 = vadd.xlane.f32.xlu0 %v611_v10  ;;  %v620_v24 = vsel %vm318_vm0, %v604_v11, 0.0  ;;  %v607_v27 = vmul.f32 %v1102_v19, %v973_v62 }
 0x10d   : > { %618 = vadd.xlane.f32.xlu1 %v617_v15  ;;  %v626_v28 = vsel %vm318_vm0, %v606_v25, 0.0 }
 0x10e   : > { %v629_v29 = vsel %vm318_vm0, %v607_v27, 0.0 }
 0x110   : > { %621 = vadd.xlane.f32.xlu0 %v620_v24 }
 0x111   : > { %624 = vadd.xlane.f32.xlu1 %v623_v26 }
 0x114   : > { %627 = vadd.xlane.f32.xlu0 %v626_v28 }
 0x115   : > { %630 = vadd.xlane.f32.xlu1 %v629_v29 }
 0x195   : > { %v610_v31 = vpop.xlane.xlu0 %609 }
 0x196   : > { %v616_v32 = vpop.xlane.xlu1 %615  ;;  %v634_v33 = vadd.f32 %v633_v30, %v610_v31 }
 0x197   : > { %v636_v34 = vadd.f32 %v633_v30, %v616_v32 }
 0x198   : > { %v642_v35 = vrot.slane %v634_v33, 4 }
 0x199   : > { %v654_v36 = vrot.slane %v636_v34, 4  ;;  %v613_v37 = vpop.xlane.xlu0 %612 }
 0x19a   : > { %v643_v38 = vmax.f32 %v634_v33, %v642_v35  ;;  %v619_v39 = vpop.xlane.xlu1 %618  ;;  %v635_v40 = vadd.f32 %v633_v30, %v613_v37 }
 0x19b   : > { %v655_v41 = vmax.f32 %v636_v34, %v654_v36  ;;  %v637_v42 = vadd.f32 %v633_v30, %v619_v39 }
 0x19c   : > { %v644_v43 = vrot.slane %v643_v38, 2  ;;  %v648_v44 = vrot.slane %v635_v40, 4 }
 0x19d   : > { %v656_v45 = vrot.slane %v655_v41, 2  ;;  %v660_v46 = vrot.slane %v637_v42, 4  ;;  %v622_v47 = vpop.xlane.xlu0 %621 }
 0x19e   : > { %v645_v48 = vmax.f32 %v643_v38, %v644_v43  ;;  %v649_v49 = vmax.f32 %v635_v40, %v648_v44  ;;  %v625_v50 = vpop.xlane.xlu1 %624  ;;  %v638_v51 = vadd.f32 %v633_v30, %v622_v47 }
 0x19f   : > { %v657_v52 = vmax.f32 %v655_v41, %v656_v45  ;;  %v661_v53 = vmax.f32 %v637_v42, %v660_v46  ;;  %v639_v54 = vadd.f32 %v633_v30, %v625_v50 }
 0x1a0   : > { %v646_v55 = vrot.slane %v645_v48, 1  ;;  %v650_v56 = vrot.slane %v649_v49, 2  ;;  %v666_v57 = vrot.slane %v638_v51, 4 }
 0x1a1   : > { %v658_v58 = vrot.slane %v657_v52, 1  ;;  %v662_v59 = vrot.slane %v661_v53, 2  ;;  %v672_v60 = vrot.slane %v639_v54, 4  ;;  %v628_v61 = vpop.xlane.xlu0 %627 }
 0x1a2   : > { %v647_v62 = vmax.f32 %v645_v48, %v646_v55  ;;  %v651_v63 = vmax.f32 %v649_v49, %v650_v56  ;;  %v667_v0 = vmax.f32 %v638_v51, %v666_v57  ;;  %v631_v1 = vpop.xlane.xlu1 %630  ;;  %v640_v2 = vadd.f32 %v633_v30, %v628_v61 }
 0x1a3   : > { %v659_v3 = vmax.f32 %v657_v52, %v658_v58  ;;  %v663_v4 = vmax.f32 %v661_v53, %v662_v59  ;;  %v673_v5 = vmax.f32 %v639_v54, %v672_v60  ;;  %v641_v6 = vadd.f32 %v633_v30, %v631_v1 }
 0x1a4   : > { %v690_v7 = vsub.f32 %v634_v33, %v647_v62  ;;  %v652_v8 = vrot.slane %v651_v63, 1  ;;  %v668_v9 = vrot.slane %v667_v0, 2  ;;  %v678_v10 = vrot.slane %v640_v2, 4 }
 0x1a5   : > { %v692_v11 = vsub.f32 %v636_v34, %v659_v3  ;;  %v664_v13 = vrot.slane %v663_v4, 1  ;;  %v674_v15 = vrot.slane %v673_v5, 2  ;;  %v684_v17 = vrot.slane %v641_v6, 4 }
 0x1a6   : > { %v698_v19 = vmul.f32 1.442695, %v690_v7  ;;  %v653_v24 = vmax.f32 %v651_v63, %v652_v8  ;;  %v669_v25 = vmax.f32 %v667_v0, %v668_v9  ;;  %v679_v26 = vmax.f32 %v640_v2, %v678_v10 }
 0x1a7   : > { %v702_v27 = vmul.f32 1.442695, %v692_v11  ;;  %v665_v28 = vmax.f32 %v663_v4, %v664_v13  ;;  %v675_v29 = vmax.f32 %v673_v5, %v674_v15  ;;  %v685_v31 = vmax.f32 %v641_v6, %v684_v17 }
 0x1a8   : > { %1103 = vpow2.f32 %v698_v19  ;;  %v691_v32 = vsub.f32 %v635_v40, %v653_v24  ;;  %v670_v35 = vrot.slane %v669_v25, 1  ;;  %v680_v30 = vrot.slane %v679_v26, 2 }
 0x1a9   : > { %1105 = vpow2.f32 %v702_v27  ;;  %v693_v33 = vsub.f32 %v637_v42, %v665_v28  ;;  %v676_v36 = vrot.slane %v675_v29, 1  ;;  %v686_v37 = vrot.slane %v685_v31, 2 }
 0x1aa   : > { %v700_v34 = vmul.f32 1.442695, %v691_v32  ;;  %v671_v38 = vmax.f32 %v669_v25, %v670_v35  ;;  %v681_v39 = vmax.f32 %v679_v26, %v680_v30 }
 0x1ab   : > { %v704_v41 = vmul.f32 1.442695, %v693_v33  ;;  %v677_v43 = vmax.f32 %v675_v29, %v676_v36  ;;  %v687_v44 = vmax.f32 %v685_v31, %v686_v37 }
 0x1ac   : > { %1107 = vpow2.f32 %v700_v34  ;;  %v694_v45 = vsub.f32 %v638_v51, %v671_v38  ;;  %v682_v46 = vrot.slane %v681_v39, 1 }
 0x1ad   : > { %1109 = vpow2.f32 %v704_v41  ;;  %v695_v47 = vsub.f32 %v639_v54, %v677_v43  ;;  %v688_v48 = vrot.slane %v687_v44, 1 }
 0x1ae   : > { %v706_v49 = vmul.f32 1.442695, %v694_v45  ;;  %v683_v40 = vmax.f32 %v681_v39, %v682_v46 }
 0x1af   : > { %v708_v50 = vmul.f32 1.442695, %v695_v47  ;;  %v689_v52 = vmax.f32 %v687_v44, %v688_v48 }
 0x1b0   : > { %1111 = vpow2.f32 %v706_v49  ;;  %v696_v42 = vsub.f32 %v640_v2, %v683_v40 }
 0x1b1   : > { %1113 = vpow2.f32 %v708_v50  ;;  %v697_v53 = vsub.f32 %v641_v6, %v689_v52 }
 0x1b2   : > { %v1381_v55 = vpop.eup %1103  ;;  %v710_v56 = vmul.f32 1.442695, %v696_v42 }
 0x1b3   : > { %v1383_v57 = vpop.eup %1105  ;;  %v714_v58 = vrot.slane %v1381_v55, 4  ;;  %v712_v51 = vmul.f32 1.442695, %v697_v53 }
 0x1b4   : > { %v726_v59 = vrot.slane %v1383_v57, 4  ;;  %1115 = vpow2.f32 %v710_v56 }
 0x1b5   : > { %v715_v54 = vadd.f32 %v1381_v55, %v714_v58  ;;  %1117 = vpow2.f32 %v712_v51 }
 0x1b6   : > { %v1388_v60 = vpop.eup %1107  ;;  %v727_v61 = vadd.f32 %v1383_v57, %v726_v59 }
 0x1b7   : > { %v1391_v62 = vpop.eup %1109  ;;  %v716_v63 = vrot.slane %v715_v54, 2  ;;  %v720_v0 = vrot.slane %v1388_v60, 4 }
 0x1b8   : > { %v728_v1 = vrot.slane %v727_v61, 2  ;;  %v732_v2 = vrot.slane %v1391_v62, 4 }
 0x1b9   : > { %v717_v3 = vadd.f32 %v716_v63, %v715_v54  ;;  %v721_v4 = vadd.f32 %v1388_v60, %v720_v0 }
 0x1ba   : > { %v1396_v5 = vpop.eup %1111  ;;  %v729_v6 = vadd.f32 %v728_v1, %v727_v61  ;;  %v733_v7 = vadd.f32 %v1391_v62, %v732_v2 }
 0x1bb   : > { %v1399_v8 = vpop.eup %1113  ;;  %v718_v9 = vrot.slane %v717_v3, 1  ;;  %v722_v10 = vrot.slane %v721_v4, 2  ;;  %v738_v11 = vrot.slane %v1396_v5, 4 }
 0x1bc   : > { %v730_v13 = vrot.slane %v729_v6, 1  ;;  %v734_v15 = vrot.slane %v733_v7, 2  ;;  %v744_v17 = vrot.slane %v1399_v8, 4 }
 0x1bd   : > { %v719_v19 = vadd.f32 %v718_v9, %v717_v3  ;;  %v723_v24 = vadd.f32 %v722_v10, %v721_v4  ;;  %v739_v25 = vadd.f32 %v1396_v5, %v738_v11 }
 0x1be   : > { %v1404_v26 = vpop.eup %1115  ;;  %v731_v27 = vadd.f32 %v730_v13, %v729_v6  ;;  %v735_v28 = vadd.f32 %v734_v15, %v733_v7  ;;  %v745_v29 = vadd.f32 %v1399_v8, %v744_v17 }
 0x1bf   : > { %v1407_v31 = vpop.eup %1117  ;;  %1119 = vrcp.f32 %v719_v19  ;;  %v724_v32 = vrot.slane %v723_v24, 1  ;;  %v740_v35 = vrot.slane %v739_v25, 2  ;;  %v750_v30 = vrot.slane %v1404_v26, 4 }
 0x1c0   : > { %1121 = vrcp.f32 %v731_v27  ;;  %v736_v33 = vrot.slane %v735_v28, 1  ;;  %v746_v36 = vrot.slane %v745_v29, 2  ;;  %v756_v37 = vrot.slane %v1407_v31, 4 }
 0x1c1   : > { %v725_v34 = vadd.f32 %v724_v32, %v723_v24  ;;  %v741_v38 = vadd.f32 %v740_v35, %v739_v25  ;;  %v751_v39 = vadd.f32 %v1404_v26, %v750_v30 }
 0x1c2   : > { %v737_v41 = vadd.f32 %v736_v33, %v735_v28  ;;  %v747_v43 = vadd.f32 %v746_v36, %v745_v29  ;;  %v757_v44 = vadd.f32 %v1407_v31, %v756_v37 }
 0x1c3   : > { %1123 = vrcp.f32 %v725_v34  ;;  %v742_v45 = vrot.slane %v741_v38, 1  ;;  %v752_v46 = vrot.slane %v751_v39, 2 }
 0x1c4   : > { %1125 = vrcp.f32 %v737_v41  ;;  %v748_v47 = vrot.slane %v747_v43, 1  ;;  %v758_v48 = vrot.slane %v757_v44, 2 }
 0x1c5   : > { %v743_v49 = vadd.f32 %v742_v45, %v741_v38  ;;  %v753_v40 = vadd.f32 %v752_v46, %v751_v39 }
 0x1c6   : > { %v749_v50 = vadd.f32 %v748_v47, %v747_v43  ;;  %v759_v52 = vadd.f32 %v758_v48, %v757_v44 }
 0x1c7   : > { %1127 = vrcp.f32 %v743_v49  ;;  %v754_v42 = vrot.slane %v753_v40, 1 }
 0x1c8   : > { %v760_v53 = vrot.slane %v759_v52, 1  ;;  %1129 = vrcp.f32 %v749_v50 }
 0x1c9   : > { %v1120_v56 = vpop.eup %1119  ;;  %v755_v58 = vadd.f32 %v754_v42, %v753_v40 }
 0x1ca   : > { %v1122_v51 = vpop.eup %1121  ;;  %v770_v59 = vmul.f32 %v1120_v56, %v1381_v55  ;;  %v761_v54 = vadd.f32 %v760_v53, %v759_v52 }
 0x1cb   : > { %1131 = vrcp.f32 %v755_v58  ;;  %v772_v61 = vmul.f32 %v1122_v51, %v1383_v57 }
 0x1cc   : > { %1133 = vrcp.f32 %v761_v54  ;;  %v778_v63 = vmul.f32 %v770_v59, %v1320_v12 }
 0x1cd   : > { %v1124_v0 = vpop.eup %1123  ;;  %v780_v1 = vmul.f32 %v772_v61, %v1330_v16 }
 0x1ce   : > { %v1126_v2 = vpop.eup %1125  ;;  %v771_v3 = vmul.f32 %v1124_v0, %v1388_v60  ;;  %v786_v4 = vsel %vm318_vm0, %v778_v63, 0.0 }
 0x1cf   : > { %v773_v6 = vmul.f32 %v1126_v2, %v1391_v62  ;;  %v787_v7 = vrot.slane %v786_v4, 4  ;;  %v800_v55 = vsel %vm318_vm0, %v780_v1, 0.0 }
 0x1d0   : > { %v779_v9 = vmul.f32 %v771_v3, %v1327_v14  ;;  %v801_v10 = vrot.slane %v800_v55, 4 }
 0x1d1   : > { %v1128_v57 = vpop.eup %1127  ;;  %v781_v11 = vmul.f32 %v773_v6, %v1337_v18  ;;  %v788_v12 = vadd.f32 %v787_v7, %v786_v4 }
 0x1d2   : > { %v1130_v13 = vpop.eup %1129  ;;  %v774_v16 = vmul.f32 %v1128_v57, %v1396_v5  ;;  %v793_v15 = vsel %vm318_vm0, %v779_v9, 0.0  ;;  %v802_v60 = vadd.f32 %v801_v10, %v800_v55 }
 0x1d3   : > { %v775_v17 = vmul.f32 %v1130_v13, %v1399_v8  ;;  %v789_v19 = vrot.slane %v788_v12, 2  ;;  %v794_v62 = vrot.slane %v793_v15, 4  ;;  %v807_v24 = vsel %vm318_vm0, %v781_v11, 0.0 }
 0x1d4   : > { %v782_v25 = vmul.f32 %v774_v16, %v1340_v20  ;;  %v803_v14 = vrot.slane %v802_v60, 2  ;;  %v808_v27 = vrot.slane %v807_v24, 4 }
 0x1d5   : > { %v1132_v28 = vpop.eup %1131  ;;  %v783_v18 = vmul.f32 %v775_v17, %v1347_v21  ;;  %v790_v29 = vadd.f32 %v789_v19, %v788_v12  ;;  %v795_v32 = vadd.f32 %v794_v62, %v793_v15 }
 0x1d6   : > { %v1134_v35 = vpop.eup %1133  ;;  %v776_v5 = vmul.f32 %v1132_v28, %v1404_v26  ;;  %v804_v30 = vadd.f32 %v803_v14, %v802_v60  ;;  %v809_v33 = vadd.f32 %v808_v27, %v807_v24  ;;  %v814_v8 = vsel %vm318_vm0, %v782_v25, 0.0 }
 0x1d7   : > { %v777_v36 = vmul.f32 %v1134_v35, %v1407_v31  ;;  %v796_v37 = vrot.slane %v795_v32, 2  ;;  %v815_v34 = vrot.slane %v814_v8, 4  ;;  %v821_v39 = vsel %vm318_vm0, %v783_v18, 0.0 }
 0x1d8   : > { %v784_v20 = vmul.f32 %v776_v5, %v1349_v22  ;;  %v810_v38 = vrot.slane %v809_v33, 2  ;;  %v791_v41 = vrot.slane %v790_v29, 1  ;;  %v805_v44 = vrot.slane %v804_v30, 1 }
 0x1d9   : > { %v785_v21 = vmul.f32 %v777_v36, %v1355_v23  ;;  %v797_v43 = vadd.f32 %v796_v37, %v795_v32  ;;  %v816_v26 = vadd.f32 %v815_v34, %v814_v8  ;;  %v822_v46 = vrot.slane %v821_v39, 4 }
 0x1da   : > { %v811_v45 = vadd.f32 %v810_v38, %v809_v33  ;;  %v828_v47 = vsel %vm318_vm0, %v784_v20, 0.0  ;;  %v792_v23 = vadd.f32 %v791_v41, %v790_v29  ;;  %v806_v58 = vadd.f32 %v805_v44, %v804_v30 }
 0x1db   : > { %v798_v31 = vrot.slane %v797_v43, 1  ;;  %v817_v48 = vrot.slane %v816_v26, 2  ;;  %v829_v49 = vrot.slane %v828_v47, 4  ;;  %v835_v22 = vsel %vm318_vm0, %v785_v21, 0.0 }
 0x1dc   : > { %v812_v40 = vrot.slane %v811_v45, 1  ;;  %v823_v50 = vadd.f32 %v822_v46, %v821_v39  ;;  %v836_v52 = vrot.slane %v835_v22, 4 }
 0x1dd   : > { %v799_v42 = vadd.f32 %v798_v31, %v797_v43  ;;  %v818_v53 = vadd.f32 %v817_v48, %v816_v26  ;;  %v830_v56 = vadd.f32 %v829_v49, %v828_v47 }
 0x1de   : > { %v824_v51 = vrot.slane %v823_v50, 2  ;;  %v837_v59 = vadd.f32 %v836_v52, %v835_v22  ;;  %v813_v54 = vadd.f32 %v812_v40, %v811_v45 }
 0x1df   : > { %v819_v61 = vrot.slane %v818_v53, 1  ;;  %v831_v63 = vrot.slane %v830_v56, 2  ;;  %v851_v0 = vsel %vm850_vm2, %v799_v42, %v792_v23 }
 0x1e0   : > { %v825_v1 = vadd.f32 %v824_v51, %v823_v50  ;;  %v838_v2 = vrot.slane %v837_v59, 2  ;;  %v853_v3 = vsel %vm852_vm3, %v806_v58, %v851_v0 }
 0x1e1   : > { %v820_v4 = vadd.f32 %v819_v61, %v818_v53  ;;  %v832_v6 = vadd.f32 %v831_v63, %v830_v56  ;;  %v855_v7 = vsel %vm854_vm4, %v813_v54, %v853_v3 }
 0x1e2   : > { %v826_v55 = vrot.slane %v825_v1, 1  ;;  %v839_v9 = vadd.f32 %v838_v2, %v837_v59 }
 0x1e3   : > { %v833_v10 = vrot.slane %v832_v6, 1  ;;  %v857_v57 = vsel %vm856_vm5, %v820_v4, %v855_v7 }
 0x1e4   : > { %v827_v11 = vadd.f32 %v826_v55, %v825_v1  ;;  %v840_v12 = vrot.slane %v839_v9, 1 }
 0x1e5   : > { %v834_v13 = vadd.f32 %v833_v10, %v832_v6 }
 0x1e6   : > { %v841_v16 = vadd.f32 %v840_v12, %v839_v9  ;;  %v859_v15 = vsel %vm858_vm6, %v827_v11, %v857_v57 }
 0x1e7   : > { %v861_v60 = vsel %vm860_vm7, %v834_v13, %v859_v15 }
 0x1e8   : > { %v863_v17 = vsel %vm862_vm8, %v841_v16, %v861_v60 }
 0x1e9   : > { %865 = vst.msk [vmem:[%s289_s18] sm:$0xff] %vm318_vm0, %v863_v17 }
 0x1ea   : > { %1148 = shalt.err (!%p1145_p4)
}
 0x1eb   : > { %s1149_s9 = scalar_lea.hbm %s1449_s24, 128  ;;  %s1153_s15 = scalar_lea.hbm %s1501_s7, 256 }
 0x1ec   : > { %p1150_p7 = scmp.ne.s32.totalorder %s1449_s24, %s1149_s9  ;;  %p1154_p10 = scmp.lt.u32.totalorder %s1449_s24, %s1501_s7 }
 0x1ed   : > { %p1155_p11 = scmp.lt.u32.totalorder %s1153_s15, %s1149_s9  ;;  %p1157_p13 = scmp.lt.u32.totalorder %s1149_s9, %s1449_s24 }
 0x1ee   : > { %p1151_p8 = pnand %p1150_p7, %p1281_p5 }
 0x1ef   : > { %p1156_p12 = por %p1155_p11, %p1154_p10 }
 0x1f0   : > { %p1152_p9 = pneg %p1151_p8 }
 0x1f1   : > { %p1158_p0 = por %p1157_p13, %p1156_p12 }
 0x1f3   : > { %p1159_p1 = pnand %p1158_p0, %p1152_p9 }
 0x1f5   : > { %1162 = shalt.err (!%p1159_p1)
}
 0x1f6   : > { %1048 = dma.vmem_to_hbm [thread:$0]  (%p1281_p5), %s1451_s19, 128, %s1449_s24, %s867_s6  }
 0x1f7 PF: > { %p1054_p2 = scmp.ge.s32.totalorder %s1197_s29, 2  ;;  %s892_s18 = sand.u32 1, %s1185_s26  }
 0x1f8   : > { %s893_s22 = scalar_lea.sflag [#allocation4], %s892_s18 }
 0x1f9   : > { %p1051_p3 = pnand %p1054_p2, %p1285_p6 }
 0x1fb   : > { %1180 = dma.done.wait (!%p1051_p3), %s893_s22, 128  }
 0x1fc   : > { %1182 = vsyncadd (!%p1051_p3), %s893_s22, 4294967168  ;;  %p18_p4 = scmp.ge.s32.totalorder %s1268_s8, 4   ;;  %s1504_s26 = smov %s1189_s27 }
 0x1fd   : > { %s1505_s27 = smov %s1193_s28  ;;  %s1506_s28 = smov %s1279_s11 }
 0x1fe   : > { %s1507_s29 = smov %s1268_s8  ;;  %20 = sbr.rel (!%p18_p4) target bundleno = 5 (0x5), region = 86 }
 0x205   :  { %898 = vsyncpa [#allocation4], 1 }
 0x206   :  { %900 = vsyncpa [#allocation4 + $0x1], 1 }

</bundles_post_ra>
